<compile_context>
chip_gen: v5e
topology: v5e:2x2
jax: 0.10.0
libtpu: 0.0.40
codegen_flags: <defaults>
</compile_context>

<pallas_src>
import numpy as np
import jax
import jax.numpy as jnp
from jax import lax
from jax.experimental import pallas as pl
from jax.experimental.pallas import tpu as pltpu


_FLAME_SENTINEL = 149921


def _round_up(x, m):
    return ((x + m - 1) // m) * m


def _pick_tile(P, tile_p):
    tile_p = max(128, min(tile_p, P))
    tile_p -= tile_p % 128
    while P % tile_p != 0:
        tile_p -= 128
    return tile_p


def _make_uv_kernel(v_chunk, n_chunks, compute_dtype):
    def kernel(verts_ref, idx_ref, bw_ref, out_ref):
        # verts_ref: (M, Vpad)   idx_ref/bw_ref: (3, TP)   out_ref: (M, TP)
        M = verts_ref.shape[0]
        TP = idx_ref.shape[1]

        idx0 = idx_ref[0:1, :]
        idx1 = idx_ref[1:2, :]
        idx2 = idx_ref[2:3, :]
        bw0 = bw_ref[0:1, :].astype(compute_dtype)
        bw1 = bw_ref[1:2, :].astype(compute_dtype)
        bw2 = bw_ref[2:3, :].astype(compute_dtype)
        zero = jnp.zeros((), compute_dtype)

        # Small per-chunk iota; broadcast across lanes happens inside the compare.
        iota_c = lax.broadcasted_iota(jnp.int32, (v_chunk, 1), 0)

        def body(c, acc):
            v0 = pl.multiple_of(c * v_chunk, v_chunk)
            vid = iota_c + v0                                       # (v_chunk, 1)
            # Weighted one-hot chunk; weights are SUMMED so duplicated corner indices
            # (e.g. two 149921 sentinels remapped to 0) keep PyTorch gather semantics.
            w = jnp.where(idx0 == vid, bw0, zero)
            w = w + jnp.where(idx1 == vid, bw1, zero)
            w = w + jnp.where(idx2 == vid, bw2, zero)               # (v_chunk, TP)
            vcols = verts_ref[:, pl.ds(v0, v_chunk)].astype(compute_dtype)
            return acc + jnp.dot(vcols, w, preferred_element_type=jnp.float32)

        acc = jnp.zeros((M, TP), dtype=jnp.float32)
        acc = lax.fori_loop(0, n_chunks, body, acc,
                            unroll=True if n_chunks <= 16 else 4)
        out_ref[...] = acc.astype(out_ref.dtype)

    return kernel


def prepare_uv_tables(v_index, bary_weights, num_verts):
    """One-time preprocessing of the constant module buffers (module __init__ analogue).

    Returns (idx_cp, bw_cp, (H, W)):
      idx_cp: (3, H*W) int32, sentinel 149921 remapped to 0, channels-first.
      bw_cp:  (3, H*W) float32, channels-first (pixels on the lane axis).
    """
    v_index = np.asarray(v_index)
    bary_weights = np.asarray(bary_weights, dtype=np.float32)
    H, W, K = v_index.shape
    assert K == 3 and bary_weights.shape == (H, W, 3)
    idx = np.where(v_index == _FLAME_SENTINEL, 0, v_index).astype(np.int64)
    if idx.min() < 0 or idx.max() >= num_verts:
        raise ValueError(
            "v_index contains entries outside [0, num_verts) after the "
            f"{_FLAME_SENTINEL}->0 remap; the gather would silently drop them.")
    idx = idx.astype(np.int32)
    P = H * W
    idx_cp = jnp.asarray(np.ascontiguousarray(idx.reshape(P, 3).T))           # (3, P)
    bw_cp = jnp.asarray(np.ascontiguousarray(bary_weights.reshape(P, 3).T))   # (3, P)
    return idx_cp, bw_cp, (H, W)


def flame_uv_map(verts, idx_cp, bw_cp, uv_hw, *, tile_p=1024, v_chunk=512,
                 compute_dtype=jnp.float32, vmem_limit_bytes=32 * 1024 * 1024):
    """Pallas implementation of FLAME_UV_Generator.forward / get_UV_map."""
    if verts.ndim == 2:
        verts = verts[None]
    B, V, C = verts.shape
    H, W = uv_hw
    P = H * W
    assert C == 3
    assert idx_cp.shape == (3, P) and bw_cp.shape == (3, P)
    assert P % 128 == 0, "H*W must be a multiple of 128"

    tile_p = _pick_tile(P, tile_p)
    v_chunk = max(128, v_chunk - v_chunk % 128)
    v_chunk = min(v_chunk, _round_up(V, 128))
    v_pad = _round_up(V, v_chunk)
    n_chunks = v_pad // v_chunk

    # Batch folded into the matmul M dimension: (B, V, 3) -> (B*3, Vpad), V on lanes.
    M = B * C
    verts_cf = jnp.transpose(verts, (0, 2, 1)).reshape(M, V)
    if v_pad > V:
        verts_cf = jnp.pad(verts_cf, ((0, 0), (0, v_pad - V)))

    grid = (P // tile_p,)
    kernel = _make_uv_kernel(v_chunk, n_chunks, compute_dtype)

    out_cf = pl.pallas_call(
        kernel,
        out_shape=jax.ShapeDtypeStruct((M, P), verts.dtype),
        grid_spec=pltpu.PrefetchScalarGridSpec(
            num_scalar_prefetch=0,
            grid=grid,
            in_specs=[
                pl.BlockSpec((M, v_pad), lambda p: (0, 0)),     # resident verts
                pl.BlockSpec((3, tile_p), lambda p: (0, p)),    # index tile
                pl.BlockSpec((3, tile_p), lambda p: (0, p)),    # bary tile
            ],
            out_specs=pl.BlockSpec((M, tile_p), lambda p: (0, p)),
        ),
        compiler_params=pltpu.CompilerParams(
            dimension_semantics=("parallel",),
            vmem_limit_bytes=vmem_limit_bytes),
    )(verts_cf, idx_cp, bw_cp)

    # back to the PyTorch output layout (B, H, W, 3)
    return jnp.transpose(out_cf.reshape(B, C, P), (0, 2, 1)).reshape(B, H, W, C)


def ref_uv_map(verts, v_index, bary_weights):
    """Pure-JAX reference matching the PyTorch get_UV_map."""
    if verts.ndim == 2:
        verts = verts[None]
    v_index = jnp.where(v_index == _FLAME_SENTINEL, 0, v_index)
    im = verts[:, v_index, :]                                   # (B, H, W, 3, 3)
    out = jnp.einsum('hwk,bhwkc->bhwc',
                     bary_weights.astype(jnp.float32),
                     im.astype(jnp.float32))
    return out.astype(verts.dtype)


if __name__ == "__main__":
    key = jax.random.PRNGKey(0)

    def run_case(B, V, H, W, tile_p, v_chunk, k):
        kv, ki, kw = jax.random.split(k, 3)
        verts = jax.random.normal(kv, (B, V, 3), dtype=jnp.float32)
        v_index = jax.random.randint(ki, (H, W, 3), 0, V, dtype=jnp.int32)
        # exercise the 149921 sentinel remap (and duplicate-index weight summation)
        v_index = v_index.at[0, 0, :2].set(_FLAME_SENTINEL)
        v_index = v_index.at[H - 1, W - 1, 1].set(_FLAME_SENTINEL)
        bw_raw = jax.random.uniform(kw, (H, W, 3), dtype=jnp.float32) + 1e-3
        bary_weights = bw_raw / jnp.sum(bw_raw, axis=-1, keepdims=True)

        # constant-buffer preprocessing done once (module __init__ analogue)
        idx_cp, bw_cp, uv_hw = prepare_uv_tables(
            np.asarray(v_index), np.asarray(bary_weights), num_verts=V)

        out = flame_uv_map(verts, idx_cp, bw_cp, uv_hw,
                           tile_p=tile_p, v_chunk=v_chunk)
        out = jax.block_until_ready(out)

        expected = ref_uv_map(verts, v_index, bary_weights)
        assert out.shape == (B, H, W, 3), out.shape
        max_err = float(jnp.max(jnp.abs(out - expected)))
        assert jnp.allclose(out, expected, atol=1e-5, rtol=1e-5), \
            (B, V, H, W, max_err)

    k1, k2 = jax.random.split(key)
    # single pixel tile, single vertex chunk
    run_case(B=2, V=64, H=16, W=16, tile_p=512, v_chunk=512, k=k1)
    # multi-tile, multi-chunk, non-lane-aligned V (exercises padding + chunk loop)
    run_case(B=3, V=333, H=16, W=32, tile_p=256, v_chunk=128, k=k2)

    print("KERNEL_OK")
</pallas_src>

<mosaic_0001>
module attributes {stable_mosaic.version = 11 : i64} {
  func.func @kernel(%arg0: i32, %arg1: memref<6x128xf32, #tpu.memory_space<vmem>>, %arg2: memref<3x256xi32, #tpu.memory_space<vmem>>, %arg3: memref<3x256xf32, #tpu.memory_space<vmem>>, %arg4: memref<6x256xf32, #tpu.memory_space<vmem>>) attributes {dimension_semantics = [#tpu.dimension_semantics<parallel>], iteration_bounds = array<i64: 1>, scalar_prefetch = 0 : i64, scratch_operands = 0 : i64, tpu.core_type = #tpu.core_type<tc>, window_params = [{pipeline_mode = #tpu.pipeline_mode<synchronous>, transform_indices = @transform_0, window_bounds = array<i64: 6, 128>}, {transform_indices = @transform_1, window_bounds = array<i64: 3, 256>}, {transform_indices = @transform_2, window_bounds = array<i64: 3, 256>}, {transform_indices = @transform_3, window_bounds = array<i64: 6, 256>}]} {
    %c0 = arith.constant 0 : index
    %c0_0 = arith.constant 0 : index
    %0 = vector.load %arg2[%c0, %c0_0] : memref<3x256xi32, #tpu.memory_space<vmem>>, vector<1x256xi32>
    %c1 = arith.constant 1 : index
    %c0_1 = arith.constant 0 : index
    %1 = vector.load %arg2[%c1, %c0_1] : memref<3x256xi32, #tpu.memory_space<vmem>>, vector<1x256xi32>
    %c2 = arith.constant 2 : index
    %c0_2 = arith.constant 0 : index
    %2 = vector.load %arg2[%c2, %c0_2] : memref<3x256xi32, #tpu.memory_space<vmem>>, vector<1x256xi32>
    %c0_3 = arith.constant 0 : index
    %c0_4 = arith.constant 0 : index
    %3 = vector.load %arg3[%c0_3, %c0_4] : memref<3x256xf32, #tpu.memory_space<vmem>>, vector<1x256xf32>
    %c1_5 = arith.constant 1 : index
    %c0_6 = arith.constant 0 : index
    %4 = vector.load %arg3[%c1_5, %c0_6] : memref<3x256xf32, #tpu.memory_space<vmem>>, vector<1x256xf32>
    %c2_7 = arith.constant 2 : index
    %c0_8 = arith.constant 0 : index
    %5 = vector.load %arg3[%c2_7, %c0_8] : memref<3x256xf32, #tpu.memory_space<vmem>>, vector<1x256xf32>
    %6 = tpu.iota {dimensions = array<i32: 0>} : vector<128x1xi32>
    %cst = arith.constant 0.000000e+00 : f32
    %7 = vector.broadcast %cst : f32 to vector<6x256xf32>
    %cst_9 = arith.constant 0.000000e+00 : f32
    %c0_i32 = arith.constant 0 : i32
    %c128_i32 = arith.constant 128 : i32
    %8 = arith.muli %c0_i32, %c128_i32 : i32
    %9 = tpu.assume_multiple %8, 128 : i32
    %10 = vector.broadcast %9 : i32 to vector<128x1xi32>
    %11 = arith.addi %6, %10 : vector<128x1xi32>
    %12 = vector.broadcast %0 : vector<1x256xi32> to vector<128x256xi32>
    %13 = vector.broadcast %11 : vector<128x1xi32> to vector<128x256xi32>
    %14 = arith.cmpi eq, %12, %13 : vector<128x256xi32>
    %15 = vector.shape_cast %3 : vector<1x256xf32> to vector<1x256xf32>
    %16 = vector.broadcast %15 : vector<1x256xf32> to vector<128x256xf32>
    %17 = vector.broadcast %cst_9 : f32 to vector<128x256xf32>
    %18 = arith.select %14, %16, %17 : vector<128x256xi1>, vector<128x256xf32>
    %19 = vector.broadcast %1 : vector<1x256xi32> to vector<128x256xi32>
    %20 = vector.broadcast %11 : vector<128x1xi32> to vector<128x256xi32>
    %21 = arith.cmpi eq, %19, %20 : vector<128x256xi32>
    %22 = vector.shape_cast %4 : vector<1x256xf32> to vector<1x256xf32>
    %23 = vector.broadcast %22 : vector<1x256xf32> to vector<128x256xf32>
    %24 = vector.broadcast %cst_9 : f32 to vector<128x256xf32>
    %25 = arith.select %21, %23, %24 : vector<128x256xi1>, vector<128x256xf32>
    %26 = arith.addf %18, %25 : vector<128x256xf32>
    %27 = vector.broadcast %2 : vector<1x256xi32> to vector<128x256xi32>
    %28 = vector.broadcast %11 : vector<128x1xi32> to vector<128x256xi32>
    %29 = arith.cmpi eq, %27, %28 : vector<128x256xi32>
    %30 = vector.shape_cast %5 : vector<1x256xf32> to vector<1x256xf32>
    %31 = vector.broadcast %30 : vector<1x256xf32> to vector<128x256xf32>
    %32 = vector.broadcast %cst_9 : f32 to vector<128x256xf32>
    %33 = arith.select %29, %31, %32 : vector<128x256xi1>, vector<128x256xf32>
    %34 = arith.addf %26, %33 : vector<128x256xf32>
    %c0_10 = arith.constant 0 : index
    %35 = arith.index_cast %9 : i32 to index
    %36 = vector.load %arg1[%c0_10, %35] : memref<6x128xf32, #tpu.memory_space<vmem>>, vector<6x128xf32>
    %cst_11 = arith.constant dense<0.000000e+00> : vector<6x256xf32>
    %37 = tpu.matmul %36, %34, %cst_11 {dimension_numbers = #tpu.dot_dimension_numbers<[1], [0], [0], [1], [0, 0, 1, 1], [], []>} : vector<6x128xf32>, vector<128x256xf32>, vector<6x256xf32> -> vector<6x256xf32>
    %38 = arith.addf %7, %37 : vector<6x256xf32>
    %c1_i32 = arith.constant 1 : i32
    %c0_12 = arith.constant 0 : index
    %c0_13 = arith.constant 0 : index
    %39 = vector.load %arg4[%c0_12, %c0_13] : memref<6x256xf32, #tpu.memory_space<vmem>>, vector<6x256xf32>
    tpu.vector_store %arg4[%c0_12, %c0_13], %38 {strides = array<i32>} : memref<6x256xf32, #tpu.memory_space<vmem>>, vector<6x256xf32>,
    return
  }
  func.func @transform_0(%arg0: i32) -> (i32, i32) {
    %c0_i32 = arith.constant 0 : i32
    %c0_i32_0 = arith.constant 0 : i32
    %c0_i32_1 = arith.constant 0 : i32
    return %c0_i32, %c0_i32_0 : i32, i32
  }
  func.func @transform_1(%arg0: i32) -> (i32, i32) {
    %c0_i32 = arith.constant 0 : i32
    %c0_i32_0 = arith.constant 0 : i32
    return %c0_i32, %arg0 : i32, i32
  }
  func.func @transform_2(%arg0: i32) -> (i32, i32) {
    %c0_i32 = arith.constant 0 : i32
    %c0_i32_0 = arith.constant 0 : i32
    return %c0_i32, %arg0 : i32, i32
  }
  func.func @transform_3(%arg0: i32) -> (i32, i32) {
    %c0_i32 = arith.constant 0 : i32
    %c0_i32_0 = arith.constant 0 : i32
    return %c0_i32, %arg0 : i32, i32
  }
}

</mosaic_0001>

<bundles_post_ra>
// kernel: tpu_custom_call.1
= control target key start
LH: loop header
LB: loop body
LE: loop exit
PB: predicated region body
PF: predicated region fallthrough
CT: control target
= control target key end

     0   :  { %8 = vsyncpa [#allocation3], 0  ;;  %s873_s0 = inlined_call_operand.hbm [shape: f32[6,128], index: 0, kind: input, shape index: {}]   ;;  %s874_s1 = inlined_call_operand.hbm [shape: s32[3,256], index: 1, kind: input, shape index: {}]   ;;  %s875_s2 = inlined_call_operand.hbm [shape: f32[3,256], index: 2, kind: input, shape index: {}]   ;;  %s876_s3 = inlined_call_operand.hbm [shape: f32[6,256], index: 3, kind: output, shape index: {}]  }
   0x1   :  { %9 = vsyncpa [#allocation6], 0  ;;  %s27_s14 = sshll.u32 %s874_s1, 4  ;;  %s28_s14 = int_to_ptr.hbm [resolvable:$true] %s27_s14 }
   0x2   :  { %10 = vsyncpa [#allocation4], 0  ;;  %s544_s15 = smov [#allocation5]   ;;  %s16_s19 = sshll.u32 %s873_s0, 4  ;;  %s17_s19 = int_to_ptr.hbm [resolvable:$true] %s16_s19 }
   0x3   :  { %s29_s16 = sshll.u32 %s544_s15, 4  ;;  %s545_s20 = smov [#allocation2]   ;;  %s30_s16 = int_to_ptr.vmem [resolvable:$true] %s29_s16 }
   0x4   :  { %32 = dma.hbm_to_vmem [thread:$0]  %s28_s14, 128, %s30_s16, [#allocation6]  }
   0x5   :  { %s18_s21 = sshll.u32 %s545_s20, 4  ;;  %s38_s24 = sshll.u32 %s875_s2, 4  ;;  %s19_s21 = int_to_ptr.vmem [resolvable:$true] %s18_s21  ;;  %s39_s24 = int_to_ptr.hbm [resolvable:$true] %s38_s24 }
   0x6   :  { %21 = dma.hbm_to_vmem [thread:$0]  %s17_s19, 128, %s19_s21, [#allocation3]  }
   0x7   :  { %s546_s1 = smov [#allocation7]  }
   0x8   :  { %s40_s25 = sshll.u32 %s546_s1, 4  ;;  %s41_s25 = int_to_ptr.vmem [resolvable:$true] %s40_s25 }
   0x9   :  { %43 = dma.hbm_to_vmem [thread:$0]  %s39_s24, 128, %s41_s25, [#allocation6]  }
   0xa   :  { %538 = dma.done.wait [#allocation3], 128  }
   0xb   :  { %539 = vsyncadd [#allocation3], 4294967168 }
   0xc   :  { %540 = dma.done.wait [#allocation6], 256  }
   0xd   :  { %541 = vsyncadd [#allocation6], 4294967040  ;;  %v66_v0 = vlaneseq  ;;  %v56_v10 = vld [vmem:[#allocation5] ss:$4 sm:$0x3]  ;;  %s547_s0 = smov [#allocation8]  }
   0xe   :  { %v58_v11 = vld [vmem:[#allocation5 + $0x1] ss:$4 sm:$0x3]  ;;  %v60_v12 = vld [vmem:[#allocation5 + $0x2] ss:$4 sm:$0x3] }
   0xf   :  { %v577_v1 = vshrl.u32 %v66_v0, 7  ;;  %v61_v13 = vld [vmem:[#allocation7] ss:$4 sm:$0x3]  ;;  %v599_v16 = vperm.slane %v56_v10, 0  ;;  %v603_v18 = vperm.slane %v58_v11, 0 }
  0x10   :  { %v63_v14 = vld [vmem:[#allocation7 + $0x1] ss:$4 sm:$0x3]  ;;  %v65_v15 = vld [vmem:[#allocation7 + $0x2] ss:$4 sm:$0x3] }
  0x11   :  { %v82_v2 = vadd.s32 120, %v577_v1  ;;  %v81_v3 = vadd.s32 112, %v577_v1  ;;  %v582_v4 = vadd.s32 104, %v577_v1  ;;  %v585_v5 = vadd.s32 96, %v577_v1  ;;  %s425_s2 = sshll.u32 %s547_s0, 4  ;;  %s427_s28 = sshll.u32 %s876_s3, 4  ;;  %s426_s2 = int_to_ptr.vmem [resolvable:$true] %s425_s2  ;;  %s428_s28 = int_to_ptr.hbm [resolvable:$true] %s427_s28 }
  0x12   :  { %v588_v6 = vadd.s32 88, %v577_v1  ;;  %v591_v7 = vadd.s32 80, %v577_v1  ;;  %v594_v8 = vadd.s32 72, %v577_v1  ;;  %v597_v9 = vadd.s32 64, %v577_v1 }
  0x13   :  { %v601_v17 = vperm.slane %v61_v13, 0  ;;  %v605_v19 = vperm.slane %v63_v14, 0  ;;  %v607_v20 = vperm.slane %v60_v12, 0  ;;  %v609_v21 = vperm.slane %v65_v15, 0 }
  0x14   :  { %v611_v22 = vperm.slane %v56_v10, 1  ;;  %v613_v23 = vperm.slane %v61_v13, 1  ;;  %vm132_vm0 = vcmp.eq.s32.totalorder %v599_v16, %v82_v2  ;;  %vm203_vm1 = vcmp.eq.s32.totalorder %v603_v18, %v82_v2 }
  0x15   :  { %v617_v24 = vperm.slane %v58_v11, 1  ;;  %v619_v25 = vperm.slane %v63_v14, 1  ;;  %v169_v26 = vsel %vm132_vm0, %v601_v17, 0.0  ;;  %v240_v27 = vsel %vm203_vm1, %v605_v19, 0.0 }
  0x16   :  { %vm306_vm2 = vcmp.eq.s32.totalorder %v607_v20, %v82_v2  ;;  %vm133_vm3 = vcmp.eq.s32.totalorder %v611_v22, %v82_v2  ;;  %v272_v28 = vadd.f32 %v240_v27, %v169_v26  ;;  %v629_v32 = vperm.slane %v60_v12, 1 }
  0x17   :  { %v343_v29 = vsel %vm306_vm2, %v609_v21, 0.0  ;;  %v170_v30 = vsel %vm133_vm3, %v613_v23, 0.0  ;;  %vm204_vm4 = vcmp.eq.s32.totalorder %v617_v24, %v82_v2  ;;  %v631_v33 = vperm.slane %v65_v15, 1 }
  0x18   :  { %v241_v31 = vsel %vm204_vm4, %v619_v25, 0.0  ;;  %vm130_vm5 = vcmp.eq.s32.totalorder %v599_v16, %v81_v3  ;;  %v375_v34 = vadd.f32 %v343_v29, %v272_v28  ;;  %vm201_vm6 = vcmp.eq.s32.totalorder %v603_v18, %v81_v3 }
  0x19   :  { %v273_v35 = vadd.f32 %v241_v31, %v170_v30  ;;  %v167_v36 = vsel %vm130_vm5, %v601_v17, 0.0  ;;  %vm307_vm7 = vcmp.eq.s32.totalorder %v629_v32, %v82_v2  ;;  %v238_v37 = vsel %vm201_vm6, %v605_v19, 0.0 }
  0x1a   :  { %vm304_vm8 = vcmp.eq.s32.totalorder %v607_v20, %v81_v3  ;;  %vm131_vm9 = vcmp.eq.s32.totalorder %v611_v22, %v81_v3  ;;  %378 = vmatpush.msra.mxu0 %v375_v34  ;;  %v344_v38 = vsel %vm307_vm7, %v631_v33, 0.0  ;;  %v270_v39 = vadd.f32 %v238_v37, %v167_v36 }
  0x1b   :  { %v341_v40 = vsel %vm304_vm8, %v609_v21, 0.0  ;;  %v168_v41 = vsel %vm131_vm9, %v613_v23, 0.0  ;;  %v376_v42 = vadd.f32 %v344_v38, %v273_v35  ;;  %vm202_vm10 = vcmp.eq.s32.totalorder %v617_v24, %v81_v3 }
  0x1c   :  { %vm305_vm11 = vcmp.eq.s32.totalorder %v629_v32, %v81_v3  ;;  %vm128_vm12 = vcmp.eq.s32.totalorder %v599_v16, %v582_v4  ;;  %v373_v43 = vadd.f32 %v341_v40, %v270_v39  ;;  %v239_v44 = vsel %vm202_vm10, %v619_v25, 0.0 }
  0x1d   :  { %v342_v45 = vsel %vm305_vm11, %v631_v33, 0.0  ;;  %v165_v46 = vsel %vm128_vm12, %v601_v17, 0.0  ;;  %398 = vmatpush.msra.mxu1 %v376_v42  ;;  %v271_v47 = vadd.f32 %v239_v44, %v168_v41  ;;  %vm199_vm13 = vcmp.eq.s32.totalorder %v603_v18, %v582_v4 }
  0x1e   :  { %vm302_vm14 = vcmp.eq.s32.totalorder %v607_v20, %v582_v4  ;;  %vm129_vm15 = vcmp.eq.s32.totalorder %v611_v22, %v582_v4  ;;  %379 = vmatpush.msra.mxu0 %v373_v43  ;;  %v236_v48 = vsel %vm199_vm13, %v605_v19, 0.0  ;;  %vm200_vm0 = vcmp.eq.s32.totalorder %v617_v24, %v582_v4 }
  0x1f   :  { %v339_v49 = vsel %vm302_vm14, %v609_v21, 0.0  ;;  %v166_v50 = vsel %vm129_vm15, %v613_v23, 0.0  ;;  %v374_v51 = vadd.f32 %v342_v45, %v271_v47  ;;  %v268_v52 = vadd.f32 %v236_v48, %v165_v46 }
  0x20   :  { %v237_v53 = vsel %vm200_vm0, %v619_v25, 0.0  ;;  %vm303_vm1 = vcmp.eq.s32.totalorder %v629_v32, %v582_v4  ;;  %vm126_vm2 = vcmp.eq.s32.totalorder %v599_v16, %v585_v5  ;;  %vm197_vm3 = vcmp.eq.s32.totalorder %v603_v18, %v585_v5 }
  0x21   :  { %v269_v54 = vadd.f32 %v237_v53, %v166_v50  ;;  %v340_v55 = vsel %vm303_vm1, %v631_v33, 0.0  ;;  %399 = vmatpush.msra.mxu1 %v374_v51  ;;  %v371_v56 = vadd.f32 %v339_v49, %v268_v52  ;;  %v163_v57 = vsel %vm126_vm2, %v601_v17, 0.0 }
  0x22   :  { %v234_v58 = vsel %vm197_vm3, %v605_v19, 0.0  ;;  %vm300_vm4 = vcmp.eq.s32.totalorder %v607_v20, %v585_v5  ;;  %vm127_vm5 = vcmp.eq.s32.totalorder %v611_v22, %v585_v5  ;;  %vm198_vm6 = vcmp.eq.s32.totalorder %v617_v24, %v585_v5 }
  0x23   :  { %v372_v59 = vadd.f32 %v340_v55, %v269_v54  ;;  %v266_v60 = vadd.f32 %v234_v58, %v163_v57  ;;  %v337_v61 = vsel %vm300_vm4, %v609_v21, 0.0  ;;  %380 = vmatpush.msra.mxu0 %v371_v56  ;;  %v164_v62 = vsel %vm127_vm5, %v613_v23, 0.0 }
  0x24   :  { %vm301_vm7 = vcmp.eq.s32.totalorder %v629_v32, %v585_v5  ;;  %vm124_vm8 = vcmp.eq.s32.totalorder %v599_v16, %v588_v6  ;;  %v235_v0 = vsel %vm198_vm6, %v619_v25, 0.0  ;;  %vm195_vm9 = vcmp.eq.s32.totalorder %v603_v18, %v588_v6 }
  0x25   :  { %400 = vmatpush.msra.mxu1 %v372_v59  ;;  %v369_v63 = vadd.f32 %v337_v61, %v266_v60  ;;  %v338_v2 = vsel %vm301_vm7, %v631_v33, 0.0  ;;  %v161_v3 = vsel %vm124_vm8, %v601_v17, 0.0  ;;  %v267_v4 = vadd.f32 %v235_v0, %v164_v62 }
  0x26   :  { %vm298_vm10 = vcmp.eq.s32.totalorder %v607_v20, %v588_v6  ;;  %vm125_vm11 = vcmp.eq.s32.totalorder %v611_v22, %v588_v6  ;;  %v232_v5 = vsel %vm195_vm9, %v605_v19, 0.0  ;;  %vm196_vm12 = vcmp.eq.s32.totalorder %v617_v24, %v588_v6 }
  0x27   :  { %381 = vmatpush.msra.mxu0 %v369_v63  ;;  %v335_v10 = vsel %vm298_vm10, %v609_v21, 0.0  ;;  %v162_v11 = vsel %vm125_vm11, %v613_v23, 0.0  ;;  %v370_v12 = vadd.f32 %v338_v2, %v267_v4  ;;  %v264_v13 = vadd.f32 %v232_v5, %v161_v3 }
  0x28   :  { %v233_v14 = vsel %vm196_vm12, %v619_v25, 0.0  ;;  %vm299_vm13 = vcmp.eq.s32.totalorder %v629_v32, %v588_v6  ;;  %vm122_vm14 = vcmp.eq.s32.totalorder %v599_v16, %v591_v7  ;;  %vm193_vm15 = vcmp.eq.s32.totalorder %v603_v18, %v591_v7 }
  0x29   :  { %v265_v15 = vadd.f32 %v233_v14, %v162_v11  ;;  %v336_v26 = vsel %vm299_vm13, %v631_v33, 0.0  ;;  %401 = vmatpush.msra.mxu1 %v370_v12  ;;  %v367_v27 = vadd.f32 %v335_v10, %v264_v13  ;;  %v159_v28 = vsel %vm122_vm14, %v601_v17, 0.0 }
  0x2a   :  { %v230_v29 = vsel %vm193_vm15, %v605_v19, 0.0  ;;  %vm296_vm0 = vcmp.eq.s32.totalorder %v607_v20, %v591_v7  ;;  %vm123_vm1 = vcmp.eq.s32.totalorder %v611_v22, %v591_v7  ;;  %vm194_vm2 = vcmp.eq.s32.totalorder %v617_v24, %v591_v7 }
  0x2b   :  { %v368_v30 = vadd.f32 %v336_v26, %v265_v15  ;;  %v262_v6 = vadd.f32 %v230_v29, %v159_v28  ;;  %v333_v31 = vsel %vm296_vm0, %v609_v21, 0.0  ;;  %382 = vmatpush.msra.mxu0 %v367_v27  ;;  %v160_v34 = vsel %vm123_vm1, %v613_v23, 0.0 }
  0x2c   :  { %vm297_vm3 = vcmp.eq.s32.totalorder %v629_v32, %v591_v7  ;;  %vm120_vm4 = vcmp.eq.s32.totalorder %v599_v16, %v594_v8  ;;  %v231_v36 = vsel %vm194_vm2, %v619_v25, 0.0  ;;  %vm191_vm5 = vcmp.eq.s32.totalorder %v603_v18, %v594_v8 }
  0x2d   :  { %402 = vmatpush.msra.mxu1 %v368_v30  ;;  %v365_v35 = vadd.f32 %v333_v31, %v262_v6  ;;  %v334_v37 = vsel %vm297_vm3, %v631_v33, 0.0  ;;  %v157_v38 = vsel %vm120_vm4, %v601_v17, 0.0  ;;  %v263_v39 = vadd.f32 %v231_v36, %v160_v34 }
  0x2e   :  { %vm294_vm6 = vcmp.eq.s32.totalorder %v607_v20, %v594_v8  ;;  %vm121_vm7 = vcmp.eq.s32.totalorder %v611_v22, %v594_v8  ;;  %v228_v7 = vsel %vm191_vm5, %v605_v19, 0.0  ;;  %vm192_vm8 = vcmp.eq.s32.totalorder %v617_v24, %v594_v8 }
  0x2f   :  { %383 = vmatpush.msra.mxu0 %v365_v35  ;;  %v331_v40 = vsel %vm294_vm6, %v609_v21, 0.0  ;;  %v158_v41 = vsel %vm121_vm7, %v613_v23, 0.0  ;;  %v366_v42 = vadd.f32 %v334_v37, %v263_v39  ;;  %v260_v43 = vadd.f32 %v228_v7, %v157_v38 }
  0x30   :  { %v229_v44 = vsel %vm192_vm8, %v619_v25, 0.0  ;;  %vm295_vm9 = vcmp.eq.s32.totalorder %v629_v32, %v594_v8  ;;  %vm118_vm10 = vcmp.eq.s32.totalorder %v599_v16, %v597_v9  ;;  %vm189_vm11 = vcmp.eq.s32.totalorder %v603_v18, %v597_v9 }
  0x31   :  { %v261_v45 = vadd.f32 %v229_v44, %v158_v41  ;;  %v332_v46 = vsel %vm295_vm9, %v631_v33, 0.0  ;;  %403 = vmatpush.msra.mxu1 %v366_v42  ;;  %v363_v47 = vadd.f32 %v331_v40, %v260_v43  ;;  %v155_v48 = vsel %vm118_vm10, %v601_v17, 0.0 }
  0x32   :  { %v226_v49 = vsel %vm189_vm11, %v605_v19, 0.0  ;;  %vm292_vm12 = vcmp.eq.s32.totalorder %v607_v20, %v597_v9  ;;  %vm119_vm13 = vcmp.eq.s32.totalorder %v611_v22, %v597_v9  ;;  %vm190_vm14 = vcmp.eq.s32.totalorder %v617_v24, %v597_v9 }
  0x33   :  { %v364_v50 = vadd.f32 %v332_v46, %v261_v45  ;;  %v258_v8 = vadd.f32 %v226_v49, %v155_v48  ;;  %v329_v51 = vsel %vm292_vm12, %v609_v21, 0.0  ;;  %384 = vmatpush.msra.mxu0 %v363_v47  ;;  %v156_v52 = vsel %vm119_vm13, %v613_v23, 0.0 }
  0x34   :  { %vm293_vm15 = vcmp.eq.s32.totalorder %v629_v32, %v597_v9  ;;  %v74_v53 = vadd.s32 56, %v577_v1  ;;  %v227_v55 = vsel %vm190_vm14, %v619_v25, 0.0  ;;  %v73_v57 = vadd.s32 48, %v577_v1 }
  0x35   :  { %404 = vmatpush.msra.mxu1 %v364_v50  ;;  %v361_v54 = vadd.f32 %v329_v51, %v258_v8  ;;  %v330_v56 = vsel %vm293_vm15, %v631_v33, 0.0  ;;  %v259_v58 = vadd.f32 %v227_v55, %v156_v52  ;;  %v72_v26 = vadd.s32 40, %v577_v1 }
  0x36   :  { %vm116_vm0 = vcmp.eq.s32.totalorder %v599_v16, %v74_v53  ;;  %vm187_vm1 = vcmp.eq.s32.totalorder %v603_v18, %v74_v53  ;;  %vm290_vm2 = vcmp.eq.s32.totalorder %v607_v20, %v74_v53  ;;  %vm117_vm3 = vcmp.eq.s32.totalorder %v611_v22, %v74_v53 }
  0x37   :  { %385 = vmatpush.msra.mxu0 %v361_v54  ;;  %v153_v9 = vsel %vm116_vm0, %v601_v17, 0.0  ;;  %v224_v59 = vsel %vm187_vm1, %v605_v19, 0.0  ;;  %v327_v60 = vsel %vm290_vm2, %v609_v21, 0.0  ;;  %v362_v61 = vadd.f32 %v330_v56, %v259_v58 }
  0x38   :  { %v256_v62 = vadd.f32 %v224_v59, %v153_v9  ;;  %v154_v63 = vsel %vm117_vm3, %v613_v23, 0.0  ;;  %vm188_vm4 = vcmp.eq.s32.totalorder %v617_v24, %v74_v53  ;;  %vm291_vm5 = vcmp.eq.s32.totalorder %v629_v32, %v74_v53 }
  0x39   :  { %v225_v0 = vsel %vm188_vm4, %v619_v25, 0.0  ;;  %vm114_vm6 = vcmp.eq.s32.totalorder %v599_v16, %v73_v57  ;;  %vm185_vm7 = vcmp.eq.s32.totalorder %v603_v18, %v73_v57  ;;  %405 = vmatpush.msra.mxu1 %v362_v61  ;;  %v328_v4 = vsel %vm291_vm5, %v631_v33, 0.0 }
  0x3a   :  { %v359_v2 = vadd.f32 %v327_v60, %v256_v62  ;;  %v257_v3 = vadd.f32 %v225_v0, %v154_v63  ;;  %v151_v5 = vsel %vm114_vm6, %v601_v17, 0.0  ;;  %v222_v10 = vsel %vm185_vm7, %v605_v19, 0.0 }
  0x3b   :  { %vm288_vm8 = vcmp.eq.s32.totalorder %v607_v20, %v73_v57  ;;  %vm115_vm9 = vcmp.eq.s32.totalorder %v611_v22, %v73_v57  ;;  %vm186_vm10 = vcmp.eq.s32.totalorder %v617_v24, %v73_v57  ;;  %v254_v12 = vadd.f32 %v222_v10, %v151_v5 }
  0x3c   :  { %386 = vmatpush.msra.mxu0 %v359_v2  ;;  %v360_v11 = vadd.f32 %v328_v4, %v257_v3  ;;  %v325_v13 = vsel %vm288_vm8, %v609_v21, 0.0  ;;  %v152_v14 = vsel %vm115_vm9, %v613_v23, 0.0  ;;  %v223_v15 = vsel %vm186_vm10, %v619_v25, 0.0 }
  0x3d   :  { %vm289_vm11 = vcmp.eq.s32.totalorder %v629_v32, %v73_v57  ;;  %v71_v27 = vadd.s32 32, %v577_v1  ;;  %v357_v28 = vadd.f32 %v325_v13, %v254_v12  ;;  %v255_v29 = vadd.f32 %v223_v15, %v152_v14 }
  0x3e   :  { %406 = vmatpush.msra.mxu1 %v360_v11  ;;  %v326_v30 = vsel %vm289_vm11, %v631_v33, 0.0  ;;  %v70_v6 = vadd.s32 24, %v577_v1  ;;  %vm112_vm12 = vcmp.eq.s32.totalorder %v599_v16, %v72_v26  ;;  %vm183_vm13 = vcmp.eq.s32.totalorder %v603_v18, %v72_v26 }
  0x3f   :  { %vm286_vm14 = vcmp.eq.s32.totalorder %v607_v20, %v72_v26  ;;  %vm113_vm15 = vcmp.eq.s32.totalorder %v611_v22, %v72_v26  ;;  %387 = vmatpush.msra.mxu0 %v357_v28  ;;  %v358_v31 = vadd.f32 %v326_v30, %v255_v29  ;;  %v149_v34 = vsel %vm112_vm12, %v601_v17, 0.0 }
  0x40   :  { %v220_v35 = vsel %vm183_vm13, %v605_v19, 0.0  ;;  %v323_v36 = vsel %vm286_vm14, %v609_v21, 0.0  ;;  %v150_v38 = vsel %vm113_vm15, %v613_v23, 0.0  ;;  %vm184_vm0 = vcmp.eq.s32.totalorder %v617_v24, %v72_v26 }
  0x41   :  { %v252_v37 = vadd.f32 %v220_v35, %v149_v34  ;;  %vm287_vm1 = vcmp.eq.s32.totalorder %v629_v32, %v72_v26  ;;  %407 = vmatpush.msra.mxu1 %v358_v31  ;;  %v221_v39 = vsel %vm184_vm0, %v619_v25, 0.0  ;;  %vm110_vm2 = vcmp.eq.s32.totalorder %v599_v16, %v71_v27 }
  0x42   :  { %v324_v7 = vsel %vm287_vm1, %v631_v33, 0.0  ;;  %vm181_vm3 = vcmp.eq.s32.totalorder %v603_v18, %v71_v27  ;;  %v253_v41 = vadd.f32 %v221_v39, %v150_v38  ;;  %v147_v42 = vsel %vm110_vm2, %v601_v17, 0.0 }
  0x43   :  { %v355_v40 = vadd.f32 %v323_v36, %v252_v37  ;;  %v218_v43 = vsel %vm181_vm3, %v605_v19, 0.0  ;;  %vm284_vm4 = vcmp.eq.s32.totalorder %v607_v20, %v71_v27  ;;  %vm111_vm5 = vcmp.eq.s32.totalorder %v611_v22, %v71_v27 }
  0x44   :  { %v250_v44 = vadd.f32 %v218_v43, %v147_v42  ;;  %vm182_vm6 = vcmp.eq.s32.totalorder %v617_v24, %v71_v27  ;;  %v356_v45 = vadd.f32 %v324_v7, %v253_v41  ;;  %v321_v46 = vsel %vm284_vm4, %v609_v21, 0.0 }
  0x45   :  { %388 = vmatpush.msra.mxu0 %v355_v40  ;;  %v148_v47 = vsel %vm111_vm5, %v613_v23, 0.0  ;;  %v219_v48 = vsel %vm182_vm6, %v619_v25, 0.0  ;;  %vm285_vm7 = vcmp.eq.s32.totalorder %v629_v32, %v71_v27  ;;  %vm108_vm8 = vcmp.eq.s32.totalorder %v599_v16, %v70_v6 }
  0x46   :  { %v353_v49 = vadd.f32 %v321_v46, %v250_v44  ;;  %v251_v50 = vadd.f32 %v219_v48, %v148_v47  ;;  %408 = vmatpush.msra.mxu1 %v356_v45  ;;  %v322_v8 = vsel %vm285_vm7, %v631_v33, 0.0  ;;  %v145_v51 = vsel %vm108_vm8, %v601_v17, 0.0 }
  0x47   :  { %vm179_vm9 = vcmp.eq.s32.totalorder %v603_v18, %v70_v6  ;;  %vm282_vm10 = vcmp.eq.s32.totalorder %v607_v20, %v70_v6  ;;  %vm109_vm11 = vcmp.eq.s32.totalorder %v611_v22, %v70_v6  ;;  %vm180_vm12 = vcmp.eq.s32.totalorder %v617_v24, %v70_v6 }
  0x48   :  { %389 = vmatpush.msra.mxu0 %v353_v49  ;;  %v354_v52 = vadd.f32 %v322_v8, %v251_v50  ;;  %v216_v53 = vsel %vm179_vm9, %v605_v19, 0.0  ;;  %v319_v54 = vsel %vm282_vm10, %v609_v21, 0.0  ;;  %v146_v56 = vsel %vm109_vm11, %v613_v23, 0.0 }
  0x49   :  { %v248_v55 = vadd.f32 %v216_v53, %v145_v51  ;;  %vm283_vm13 = vcmp.eq.s32.totalorder %v629_v32, %v70_v6  ;;  %v217_v57 = vsel %vm180_vm12, %v619_v25, 0.0  ;;  %v69_v9 = vadd.s32 16, %v577_v1 }
  0x4a   :  { %409 = vmatpush.msra.mxu1 %v354_v52  ;;  %v320_v58 = vsel %vm283_vm13, %v631_v33, 0.0  ;;  %v68_v59 = vadd.s32 8, %v577_v1  ;;  %v249_v61 = vadd.f32 %v217_v57, %v146_v56  ;;  %vm102_vm14 = vcmp.eq.s32.totalorder %v599_v16, %v577_v1 }
  0x4b   :  { %v351_v60 = vadd.f32 %v319_v54, %v248_v55  ;;  %vm173_vm15 = vcmp.eq.s32.totalorder %v603_v18, %v577_v1  ;;  %vm106_vm0 = vcmp.eq.s32.totalorder %v599_v16, %v69_v9  ;;  %vm177_vm1 = vcmp.eq.s32.totalorder %v603_v18, %v69_v9 }
  0x4c   :  { %vm280_vm2 = vcmp.eq.s32.totalorder %v607_v20, %v69_v9  ;;  %vm107_vm3 = vcmp.eq.s32.totalorder %v611_v22, %v69_v9  ;;  %v352_v62 = vadd.f32 %v320_v58, %v249_v61  ;;  %v143_v63 = vsel %vm106_vm0, %v601_v17, 0.0 }
  0x4d   :  { %390 = vmatpush.msra.mxu0 %v351_v60  ;;  %v214_v0 = vsel %vm177_vm1, %v605_v19, 0.0  ;;  %v317_v2 = vsel %vm280_vm2, %v609_v21, 0.0  ;;  %v144_v4 = vsel %vm107_vm3, %v613_v23, 0.0  ;;  %vm178_vm4 = vcmp.eq.s32.totalorder %v617_v24, %v69_v9 }
  0x4e   :  { %v246_v3 = vadd.f32 %v214_v0, %v143_v63  ;;  %vm281_vm5 = vcmp.eq.s32.totalorder %v629_v32, %v69_v9  ;;  %410 = vmatpush.msra.mxu1 %v352_v62  ;;  %v215_v5 = vsel %vm178_vm4, %v619_v25, 0.0  ;;  %vm104_vm6 = vcmp.eq.s32.totalorder %v599_v16, %v68_v59 }
  0x4f   :  { %v318_v10 = vsel %vm281_vm5, %v631_v33, 0.0  ;;  %vm175_vm7 = vcmp.eq.s32.totalorder %v603_v18, %v68_v59  ;;  %v247_v12 = vadd.f32 %v215_v5, %v144_v4  ;;  %v141_v13 = vsel %vm104_vm6, %v601_v17, 0.0 }
  0x50   :  { %v349_v11 = vadd.f32 %v317_v2, %v246_v3  ;;  %v212_v14 = vsel %vm175_vm7, %v605_v19, 0.0  ;;  %vm278_vm8 = vcmp.eq.s32.totalorder %v607_v20, %v68_v59  ;;  %vm105_vm9 = vcmp.eq.s32.totalorder %v611_v22, %v68_v59 }
  0x51   :  { %v244_v15 = vadd.f32 %v212_v14, %v141_v13  ;;  %vm176_vm10 = vcmp.eq.s32.totalorder %v617_v24, %v68_v59  ;;  %v350_v26 = vadd.f32 %v318_v10, %v247_v12  ;;  %v315_v27 = vsel %vm278_vm8, %v609_v21, 0.0 }
  0x52   :  { %391 = vmatpush.msra.mxu0 %v349_v11  ;;  %v142_v28 = vsel %vm105_vm9, %v613_v23, 0.0  ;;  %v213_v29 = vsel %vm176_vm10, %v619_v25, 0.0  ;;  %vm279_vm11 = vcmp.eq.s32.totalorder %v629_v32, %v68_v59  ;;  %v139_v31 = vsel %vm102_vm14, %v601_v17, 0.0 }
  0x53   :  { %v347_v30 = vadd.f32 %v315_v27, %v244_v15  ;;  %v245_v6 = vadd.f32 %v213_v29, %v142_v28  ;;  %411 = vmatpush.msra.mxu1 %v350_v26  ;;  %v316_v34 = vsel %vm279_vm11, %v631_v33, 0.0  ;;  %v210_v35 = vsel %vm173_vm15, %v605_v19, 0.0 }
  0x54   :  { %vm276_vm12 = vcmp.eq.s32.totalorder %v607_v20, %v577_v1  ;;  %vm103_vm13 = vcmp.eq.s32.totalorder %v611_v22, %v577_v1  ;;  %v242_v37 = vadd.f32 %v210_v35, %v139_v31  ;;  %vm174_vm14 = vcmp.eq.s32.totalorder %v617_v24, %v577_v1  ;;  %v377_v22 = vld [vmem:[#allocation2] sm:$0x3f] }
  0x55   :  { %392 = vmatpush.msra.mxu0 %v347_v30  ;;  %v348_v36 = vadd.f32 %v316_v34, %v245_v6  ;;  %v313_v16 = vsel %vm276_vm12, %v609_v21, 0.0  ;;  %v140_v17 = vsel %vm103_vm13, %v613_v23, 0.0  ;;  %vm277_vm0 = vcmp.eq.s32.totalorder %v629_v32, %v577_v1 }
  0x56   :  { %v345_v18 = vadd.f32 %v313_v16, %v242_v37  ;;  %v211_v19 = vsel %vm174_vm14, %v619_v25, 0.0  ;;  %v314_v20 = vsel %vm277_vm0, %v631_v33, 0.0 }
  0x57   :  { %412 = vmatpush.msra.mxu1 %v348_v36  ;;  %v243_v38 = vadd.f32 %v211_v19, %v140_v17 }
  0x58   :  { %393 = vmatpush.msra.mxu0 %v345_v18 }
  0x59   :  { %v346_v39 = vadd.f32 %v314_v20, %v243_v38  ;;  %394 = vmatmul.f32.vlgmr.msra.gmra.mxu0 %v377_v22 }
  0x5b   :  { %413 = vmatpush.msra.mxu1 %v346_v39 }
  0x5c   :  { %414 = vmatmul.f32.vlgmr.msra.gmra.mxu1 %v377_v22 }
  0xd6   :  { %v395_v1 = vpop.f32.mrf.mxu0 }
  0xd7   :  { %418 = vst [vmem:[#allocation8] sm:$0x3f] %v395_v1 }
  0xd9   :  { %v415_v21 = vpop.f32.mrf.mxu1 }
  0xda   :  { %419 = vst [vmem:[#allocation8 + $0x8] sm:$0x3f] %v415_v21 }
  0xdb   :  { %430 = dma.vmem_to_hbm [thread:$0]  %s426_s2, 256, %s428_s28, [#allocation4]  }
  0xdc   :  { %542 = dma.done.wait [#allocation4], 256  }
  0xdd   :  { %543 = vsyncadd [#allocation4], 4294967040 }
  0xde   :  { %435 = vsyncpa [#allocation3], 1 }
  0xdf   :  { %436 = vsyncpa [#allocation6], 1 }
  0xe0   :  { %437 = vsyncpa [#allocation4], 1 }

</bundles_post_ra>
